<compile_context>
chip_gen: v6e
topology: v6e:2x2x1
jax: 0.10.0
libtpu: 0.0.40
codegen_flags: <defaults>
</compile_context>

<pallas_src>
import functools

import numpy as np
import jax
import jax.numpy as jnp
from jax import lax
from jax.experimental import pallas as pl
from jax.experimental.pallas import tpu as pltpu


def _cutout_kernel(r_ref, c_ref, x_ref, o_ref, *, C, S, cut_tile):
    # r_ref: (cutn*S, H)   stacked row-pooling matrices (resident, 1x buffered)
    # c_ref: (cutn, S, W)  per-cutout column-pooling matrices (resident)
    # x_ref: (1, C, H, W)  one image, native NCHW
    # o_ref: (1, 1, S, cut_tile*C*S)  lane-wide output slab for this cutout
    #        tile: element (i, k*C*S + c*S + j)
    W = c_ref.shape[-1]
    ct = pl.program_id(1)

    # Slice the resident pooling matrices for this cutout tile.
    row0 = ct * (cut_tile * S)
    if (cut_tile * S) % 8 == 0:
        row0 = pl.multiple_of(row0, 8)          # aligned sublane offset hint
    r_t = r_ref[pl.ds(row0, cut_tile * S), :]           # (cut_tile*S, H)
    c_t = c_ref[pl.ds(ct * cut_tile, cut_tile), :, :]   # (cut_tile, S, W)

    for ch in range(C):                                  # C is small and static
        x_c = x_ref[0, ch]                               # (H, W)
        # Stage 1: row pooling for every cutout of the tile -- one MXU matmul.
        t = jnp.dot(r_t, x_c, preferred_element_type=jnp.float32)  # (cut_tile*S, W)
        t = t.reshape(cut_tile, S, W)                    # leading-dim split only
        # Stage 2: column pooling, batched over the cutouts of this tile.
        oc = lax.dot_general(
            t, c_t,
            dimension_numbers=(((2,), (2,)), ((0,), (0,))),
            preferred_element_type=jnp.float32)          # (cut_tile, S, S): [k,i,j]
        oc = oc.astype(o_ref.dtype)
        for k in range(cut_tile):                        # static, small
            off = (k * C + ch) * S
            o_ref[0, 0, :, off:off + S] = oc[k]


def make_cutouts_pallas(x, r_mats, c_mats, *, cut_tile=None):
    """x: (N, C, H, W) f32; r_mats: (cutn, S, H); c_mats: (cutn, S, W).

    Returns (cutn*N, C, S, S), matching torch.cat of adaptive_avg_pool2d crops.
    """
    N, C, H, W = x.shape
    cutn, S, _ = r_mats.shape

    if cut_tile is None:
        # >= 2 cutout tiles when possible so both v7x TensorCores get work even
        # for N == 1; shrink further if VMEM-bound (see estimate below).
        cut_tile = max(1, cutn // 2) if cutn % 2 == 0 else cutn
    assert cutn % cut_tile == 0, "cut_tile must divide cutn"
    nct = cutn // cut_tile
    wide = cut_tile * C * S

    r_stack = r_mats.reshape(cutn * S, H)                # rows ordered (k, i)

    kernel = functools.partial(_cutout_kernel, C=C, S=S, cut_tile=cut_tile)

    # Cost model: stage-1 + stage-2 MACs; x read once, pooling mats once, out once.
    flops = 2 * N * cutn * C * S * W * (H + S)
    bytes_accessed = 4 * (N * C * H * W + cutn * S * (H + W) + N * cutn * C * S * S)

    # VMEM budget: resident pooling mats (single-buffered) + double-buffered
    # image & output blocks + f32 intermediates.  2x fudge, 16 MiB floor.
    # (For v7x's 64 MiB VMEM at large H/W/cutn, shrink cut_tile to stay <~48 MiB.)
    vmem_est = 4 * (cutn * S * (H + W)
                    + 2 * C * H * W
                    + 2 * S * wide
                    + 2 * cut_tile * S * W
                    + 2 * cut_tile * S * S)
    vmem_limit = int(max(2 * vmem_est, 16 * 2**20))

    out = pl.pallas_call(
        kernel,
        out_shape=jax.ShapeDtypeStruct((N, nct, S, wide), x.dtype),
        grid=(N, nct),
        in_specs=[
            # Pooling matrices: grid-constant full blocks, single-buffered.
            pl.BlockSpec((cutn * S, H), lambda n, ct: (0, 0),
                         pipeline_mode=pl.Buffered(1)),
            pl.BlockSpec((cutn, S, W), lambda n, ct: (0, 0, 0),
                         pipeline_mode=pl.Buffered(1)),
            # One image per batch step, native NCHW, constant across the inner
            # cutout-tile axis -> DMA'd from HBM once per image.
            pl.BlockSpec((1, C, H, W), lambda n, ct: (n, 0, 0, 0)),
        ],
        out_specs=pl.BlockSpec((1, 1, S, wide), lambda n, ct: (n, ct, 0, 0)),
        compiler_params=pltpu.CompilerParams(
            dimension_semantics=("parallel", "parallel"),
            vmem_limit_bytes=vmem_limit),
        cost_estimate=pl.CostEstimate(
            flops=flops, transcendentals=0, bytes_accessed=bytes_accessed),
    )(r_stack, c_mats, x)

    # (n, ct, i, k_in*C*S + c*S + j) -> (k*N + n, c, i, j)   (torch.cat order)
    out = out.reshape(N, nct, S, cut_tile, C, S)
    out = jnp.transpose(out, (1, 3, 0, 4, 2, 5))         # (ct, k_in, n, c, i, j)
    return out.reshape(cutn * N, C, S, S)


def build_pool_matrices(key, cutn, cut_size, H, W, cut_pow=1.0):
    """Draw (size, offsety, offsetx) per cutout and bake crop + adaptive-avg-pool
    into per-cutout pooling matrices:
      r: (cutn, S, H), c: (cutn, S, W)
    """
    max_size = min(H, W)
    min_size = min(H, W, cut_size)
    S = cut_size
    r = np.zeros((cutn, S, H), dtype=np.float32)
    c = np.zeros((cutn, S, W), dtype=np.float32)
    for k in range(cutn):
        key, k1, k2, k3 = jax.random.split(key, 4)
        u = float(jax.random.uniform(k1))
        size = int((u ** cut_pow) * (max_size - min_size) + min_size)
        size = max(size, 1)
        offsetx = int(jax.random.randint(k2, (), 0, W - size + 1))
        offsety = int(jax.random.randint(k3, (), 0, H - size + 1))
        for i in range(S):
            # adaptive_avg_pool2d window: [floor(i*size/S), ceil((i+1)*size/S))
            s = (i * size) // S
            e = -(-((i + 1) * size) // S)
            r[k, i, offsety + s: offsety + e] = 1.0 / (e - s)
            c[k, i, offsetx + s: offsetx + e] = 1.0 / (e - s)
    return jnp.asarray(r), jnp.asarray(c)


if __name__ == "__main__":
    N, C, H, W = 2, 4, 16, 16
    cut_size, cutn, cut_pow = 8, 4, 1.0

    key = jax.random.PRNGKey(0)
    kx, kr = jax.random.split(key)
    x = jax.random.normal(kx, (N, C, H, W), dtype=jnp.float32)
    r_mats, c_mats = build_pool_matrices(kr, cutn, cut_size, H, W, cut_pow)

    out = make_cutouts_pallas(x, r_mats, c_mats)          # cut_tile -> 2, grid (2, 2)
    out = jax.block_until_ready(out)

    # Pure-JAX reference: out[k*N+n, c, i, j] = sum_{h,w} R[k,i,h] x[n,c,h,w] Cm[k,j,w]
    ref = jnp.einsum("kih,nchw,kjw->kncij", r_mats, x, c_mats)
    ref = ref.reshape(cutn * N, C, cut_size, cut_size)

    assert out.shape == (cutn * N, C, cut_size, cut_size)
    np.testing.assert_allclose(np.asarray(out), np.asarray(ref), rtol=1e-5, atol=1e-5)
    print("KERNEL_OK")
</pallas_src>

<mosaic_0001>
module attributes {stable_mosaic.version = 11 : i64} {
  func.func @_cutout_kernel(%arg0: i32, %arg1: i32, %arg2: memref<32x16xf32, #tpu.memory_space<vmem>>, %arg3: memref<4x8x16xf32, #tpu.memory_space<vmem>>, %arg4: memref<1x4x16x16xf32, #tpu.memory_space<vmem>>, %arg5: memref<1x1x8x64xf32, #tpu.memory_space<vmem>>) attributes {dimension_semantics = [#tpu.dimension_semantics<parallel>, #tpu.dimension_semantics<parallel>], iteration_bounds = array<i64: 2, 2>, scalar_prefetch = 0 : i64, scratch_operands = 0 : i64, tpu.core_type = #tpu.core_type<tc>, window_params = [{pipeline_mode = #tpu.pipeline_mode<synchronous>, transform_indices = @transform_0, window_bounds = array<i64: 32, 16>}, {pipeline_mode = #tpu.pipeline_mode<synchronous>, transform_indices = @transform_1, window_bounds = array<i64: 4, 8, 16>}, {transform_indices = @transform_2, window_bounds = array<i64: 1, 4, 16, 16>}, {transform_indices = @transform_3, window_bounds = array<i64: 1, 1, 8, 64>}]} {
    %c16_i32 = arith.constant 16 : i32
    %0 = arith.muli %arg1, %c16_i32 : i32
    %1 = tpu.assume_multiple %0, 8 : i32
    %2 = arith.index_cast %1 : i32 to index
    %c0 = arith.constant 0 : index
    %3 = vector.load %arg2[%2, %c0] : memref<32x16xf32, #tpu.memory_space<vmem>>, vector<16x16xf32>
    %c2_i32 = arith.constant 2 : i32
    %4 = arith.muli %arg1, %c2_i32 : i32
    %5 = arith.index_cast %4 : i32 to index
    %c0_0 = arith.constant 0 : index
    %c0_1 = arith.constant 0 : index
    %6 = vector.load %arg3[%5, %c0_0, %c0_1] : memref<4x8x16xf32, #tpu.memory_space<vmem>>, vector<2x8x16xf32>
    %c0_2 = arith.constant 0 : index
    %c0_3 = arith.constant 0 : index
    %c0_4 = arith.constant 0 : index
    %c0_5 = arith.constant 0 : index
    %7 = vector.load %arg4[%c0_2, %c0_3, %c0_4, %c0_5] : memref<1x4x16x16xf32, #tpu.memory_space<vmem>>, vector<1x1x16x16xf32>
    %8 = vector.shape_cast %7 : vector<1x1x16x16xf32> to vector<16x16xf32>
    %cst = arith.constant dense<0.000000e+00> : vector<16x16xf32>
    %9 = tpu.matmul %3, %8, %cst {dimension_numbers = #tpu.dot_dimension_numbers<[1], [0], [0], [1], [0, 0, 1, 1], [], []>} : vector<16x16xf32>, vector<16x16xf32>, vector<16x16xf32> -> vector<16x16xf32>
    %10 = vector.shape_cast %9 : vector<16x16xf32> to vector<2x8x16xf32>
    %cst_6 = arith.constant dense<0.000000e+00> : vector<2x8x8xf32>
    %11 = tpu.matmul %10, %6, %cst_6 {dimension_numbers = #tpu.dot_dimension_numbers<[2], [2], [1], [1], [0, 0, 0, 1, 1, 1], [0], [0]>} : vector<2x8x16xf32>, vector<2x8x16xf32>, vector<2x8x8xf32> -> vector<2x8x8xf32>
    %12 = vector.extract_strided_slice %11 {offsets = [0, 0, 0], sizes = [1, 8, 8], strides = [1, 1, 1]} : vector<2x8x8xf32> to vector<1x8x8xf32>
    %13 = vector.shape_cast %12 : vector<1x8x8xf32> to vector<8x8xf32>
    %c0_7 = arith.constant 0 : index
    %c0_8 = arith.constant 0 : index
    %c0_9 = arith.constant 0 : index
    %c0_10 = arith.constant 0 : index
    %14 = vector.load %arg5[%c0_7, %c0_8, %c0_9, %c0_10] : memref<1x1x8x64xf32, #tpu.memory_space<vmem>>, vector<1x1x8x8xf32>
    %15 = vector.shape_cast %14 : vector<1x1x8x8xf32> to vector<8x8xf32>
    %16 = vector.shape_cast %13 : vector<8x8xf32> to vector<1x1x8x8xf32>
    tpu.vector_store %arg5[%c0_7, %c0_8, %c0_9, %c0_10], %16 {strides = array<i32>} : memref<1x1x8x64xf32, #tpu.memory_space<vmem>>, vector<1x1x8x8xf32>,
    %17 = vector.extract_strided_slice %11 {offsets = [1, 0, 0], sizes = [1, 8, 8], strides = [1, 1, 1]} : vector<2x8x8xf32> to vector<1x8x8xf32>
    %18 = vector.shape_cast %17 : vector<1x8x8xf32> to vector<8x8xf32>
    %c0_11 = arith.constant 0 : index
    %c0_12 = arith.constant 0 : index
    %c0_13 = arith.constant 0 : index
    %c32 = arith.constant 32 : index
    %19 = vector.load %arg5[%c0_11, %c0_12, %c0_13, %c32] : memref<1x1x8x64xf32, #tpu.memory_space<vmem>>, vector<1x1x8x8xf32>
    %20 = vector.shape_cast %19 : vector<1x1x8x8xf32> to vector<8x8xf32>
    %21 = vector.shape_cast %18 : vector<8x8xf32> to vector<1x1x8x8xf32>
    tpu.vector_store %arg5[%c0_11, %c0_12, %c0_13, %c32], %21 {strides = array<i32>} : memref<1x1x8x64xf32, #tpu.memory_space<vmem>>, vector<1x1x8x8xf32>,
    %c0_14 = arith.constant 0 : index
    %c1 = arith.constant 1 : index
    %c0_15 = arith.constant 0 : index
    %c0_16 = arith.constant 0 : index
    %22 = vector.load %arg4[%c0_14, %c1, %c0_15, %c0_16] : memref<1x4x16x16xf32, #tpu.memory_space<vmem>>, vector<1x1x16x16xf32>
    %23 = vector.shape_cast %22 : vector<1x1x16x16xf32> to vector<16x16xf32>
    %cst_17 = arith.constant dense<0.000000e+00> : vector<16x16xf32>
    %24 = tpu.matmul %3, %23, %cst_17 {dimension_numbers = #tpu.dot_dimension_numbers<[1], [0], [0], [1], [0, 0, 1, 1], [], []>} : vector<16x16xf32>, vector<16x16xf32>, vector<16x16xf32> -> vector<16x16xf32>
    %25 = vector.shape_cast %24 : vector<16x16xf32> to vector<2x8x16xf32>
    %cst_18 = arith.constant dense<0.000000e+00> : vector<2x8x8xf32>
    %26 = tpu.matmul %25, %6, %cst_18 {dimension_numbers = #tpu.dot_dimension_numbers<[2], [2], [1], [1], [0, 0, 0, 1, 1, 1], [0], [0]>} : vector<2x8x16xf32>, vector<2x8x16xf32>, vector<2x8x8xf32> -> vector<2x8x8xf32>
    %27 = vector.extract_strided_slice %26 {offsets = [0, 0, 0], sizes = [1, 8, 8], strides = [1, 1, 1]} : vector<2x8x8xf32> to vector<1x8x8xf32>
    %28 = vector.shape_cast %27 : vector<1x8x8xf32> to vector<8x8xf32>
    %c0_19 = arith.constant 0 : index
    %c0_20 = arith.constant 0 : index
    %c0_21 = arith.constant 0 : index
    %c8 = arith.constant 8 : index
    %29 = vector.load %arg5[%c0_19, %c0_20, %c0_21, %c8] : memref<1x1x8x64xf32, #tpu.memory_space<vmem>>, vector<1x1x8x8xf32>
    %30 = vector.shape_cast %29 : vector<1x1x8x8xf32> to vector<8x8xf32>
    %31 = vector.shape_cast %28 : vector<8x8xf32> to vector<1x1x8x8xf32>
    tpu.vector_store %arg5[%c0_19, %c0_20, %c0_21, %c8], %31 {strides = array<i32>} : memref<1x1x8x64xf32, #tpu.memory_space<vmem>>, vector<1x1x8x8xf32>,
    %32 = vector.extract_strided_slice %26 {offsets = [1, 0, 0], sizes = [1, 8, 8], strides = [1, 1, 1]} : vector<2x8x8xf32> to vector<1x8x8xf32>
    %33 = vector.shape_cast %32 : vector<1x8x8xf32> to vector<8x8xf32>
    %c0_22 = arith.constant 0 : index
    %c0_23 = arith.constant 0 : index
    %c0_24 = arith.constant 0 : index
    %c40 = arith.constant 40 : index
    %34 = vector.load %arg5[%c0_22, %c0_23, %c0_24, %c40] : memref<1x1x8x64xf32, #tpu.memory_space<vmem>>, vector<1x1x8x8xf32>
    %35 = vector.shape_cast %34 : vector<1x1x8x8xf32> to vector<8x8xf32>
    %36 = vector.shape_cast %33 : vector<8x8xf32> to vector<1x1x8x8xf32>
    tpu.vector_store %arg5[%c0_22, %c0_23, %c0_24, %c40], %36 {strides = array<i32>} : memref<1x1x8x64xf32, #tpu.memory_space<vmem>>, vector<1x1x8x8xf32>,
    %c0_25 = arith.constant 0 : index
    %c2 = arith.constant 2 : index
    %c0_26 = arith.constant 0 : index
    %c0_27 = arith.constant 0 : index
    %37 = vector.load %arg4[%c0_25, %c2, %c0_26, %c0_27] : memref<1x4x16x16xf32, #tpu.memory_space<vmem>>, vector<1x1x16x16xf32>
    %38 = vector.shape_cast %37 : vector<1x1x16x16xf32> to vector<16x16xf32>
    %cst_28 = arith.constant dense<0.000000e+00> : vector<16x16xf32>
    %39 = tpu.matmul %3, %38, %cst_28 {dimension_numbers = #tpu.dot_dimension_numbers<[1], [0], [0], [1], [0, 0, 1, 1], [], []>} : vector<16x16xf32>, vector<16x16xf32>, vector<16x16xf32> -> vector<16x16xf32>
    %40 = vector.shape_cast %39 : vector<16x16xf32> to vector<2x8x16xf32>
    %cst_29 = arith.constant dense<0.000000e+00> : vector<2x8x8xf32>
    %41 = tpu.matmul %40, %6, %cst_29 {dimension_numbers = #tpu.dot_dimension_numbers<[2], [2], [1], [1], [0, 0, 0, 1, 1, 1], [0], [0]>} : vector<2x8x16xf32>, vector<2x8x16xf32>, vector<2x8x8xf32> -> vector<2x8x8xf32>
    %42 = vector.extract_strided_slice %41 {offsets = [0, 0, 0], sizes = [1, 8, 8], strides = [1, 1, 1]} : vector<2x8x8xf32> to vector<1x8x8xf32>
    %43 = vector.shape_cast %42 : vector<1x8x8xf32> to vector<8x8xf32>
    %c0_30 = arith.constant 0 : index
    %c0_31 = arith.constant 0 : index
    %c0_32 = arith.constant 0 : index
    %c16 = arith.constant 16 : index
    %44 = vector.load %arg5[%c0_30, %c0_31, %c0_32, %c16] : memref<1x1x8x64xf32, #tpu.memory_space<vmem>>, vector<1x1x8x8xf32>
    %45 = vector.shape_cast %44 : vector<1x1x8x8xf32> to vector<8x8xf32>
    %46 = vector.shape_cast %43 : vector<8x8xf32> to vector<1x1x8x8xf32>
    tpu.vector_store %arg5[%c0_30, %c0_31, %c0_32, %c16], %46 {strides = array<i32>} : memref<1x1x8x64xf32, #tpu.memory_space<vmem>>, vector<1x1x8x8xf32>,
    %47 = vector.extract_strided_slice %41 {offsets = [1, 0, 0], sizes = [1, 8, 8], strides = [1, 1, 1]} : vector<2x8x8xf32> to vector<1x8x8xf32>
    %48 = vector.shape_cast %47 : vector<1x8x8xf32> to vector<8x8xf32>
    %c0_33 = arith.constant 0 : index
    %c0_34 = arith.constant 0 : index
    %c0_35 = arith.constant 0 : index
    %c48 = arith.constant 48 : index
    %49 = vector.load %arg5[%c0_33, %c0_34, %c0_35, %c48] : memref<1x1x8x64xf32, #tpu.memory_space<vmem>>, vector<1x1x8x8xf32>
    %50 = vector.shape_cast %49 : vector<1x1x8x8xf32> to vector<8x8xf32>
    %51 = vector.shape_cast %48 : vector<8x8xf32> to vector<1x1x8x8xf32>
    tpu.vector_store %arg5[%c0_33, %c0_34, %c0_35, %c48], %51 {strides = array<i32>} : memref<1x1x8x64xf32, #tpu.memory_space<vmem>>, vector<1x1x8x8xf32>,
    %c0_36 = arith.constant 0 : index
    %c3 = arith.constant 3 : index
    %c0_37 = arith.constant 0 : index
    %c0_38 = arith.constant 0 : index
    %52 = vector.load %arg4[%c0_36, %c3, %c0_37, %c0_38] : memref<1x4x16x16xf32, #tpu.memory_space<vmem>>, vector<1x1x16x16xf32>
    %53 = vector.shape_cast %52 : vector<1x1x16x16xf32> to vector<16x16xf32>
    %cst_39 = arith.constant dense<0.000000e+00> : vector<16x16xf32>
    %54 = tpu.matmul %3, %53, %cst_39 {dimension_numbers = #tpu.dot_dimension_numbers<[1], [0], [0], [1], [0, 0, 1, 1], [], []>} : vector<16x16xf32>, vector<16x16xf32>, vector<16x16xf32> -> vector<16x16xf32>
    %55 = vector.shape_cast %54 : vector<16x16xf32> to vector<2x8x16xf32>
    %cst_40 = arith.constant dense<0.000000e+00> : vector<2x8x8xf32>
    %56 = tpu.matmul %55, %6, %cst_40 {dimension_numbers = #tpu.dot_dimension_numbers<[2], [2], [1], [1], [0, 0, 0, 1, 1, 1], [0], [0]>} : vector<2x8x16xf32>, vector<2x8x16xf32>, vector<2x8x8xf32> -> vector<2x8x8xf32>
    %57 = vector.extract_strided_slice %56 {offsets = [0, 0, 0], sizes = [1, 8, 8], strides = [1, 1, 1]} : vector<2x8x8xf32> to vector<1x8x8xf32>
    %58 = vector.shape_cast %57 : vector<1x8x8xf32> to vector<8x8xf32>
    %c0_41 = arith.constant 0 : index
    %c0_42 = arith.constant 0 : index
    %c0_43 = arith.constant 0 : index
    %c24 = arith.constant 24 : index
    %59 = vector.load %arg5[%c0_41, %c0_42, %c0_43, %c24] : memref<1x1x8x64xf32, #tpu.memory_space<vmem>>, vector<1x1x8x8xf32>
    %60 = vector.shape_cast %59 : vector<1x1x8x8xf32> to vector<8x8xf32>
    %61 = vector.shape_cast %58 : vector<8x8xf32> to vector<1x1x8x8xf32>
    tpu.vector_store %arg5[%c0_41, %c0_42, %c0_43, %c24], %61 {strides = array<i32>} : memref<1x1x8x64xf32, #tpu.memory_space<vmem>>, vector<1x1x8x8xf32>,
    %62 = vector.extract_strided_slice %56 {offsets = [1, 0, 0], sizes = [1, 8, 8], strides = [1, 1, 1]} : vector<2x8x8xf32> to vector<1x8x8xf32>
    %63 = vector.shape_cast %62 : vector<1x8x8xf32> to vector<8x8xf32>
    %c0_44 = arith.constant 0 : index
    %c0_45 = arith.constant 0 : index
    %c0_46 = arith.constant 0 : index
    %c56 = arith.constant 56 : index
    %64 = vector.load %arg5[%c0_44, %c0_45, %c0_46, %c56] : memref<1x1x8x64xf32, #tpu.memory_space<vmem>>, vector<1x1x8x8xf32>
    %65 = vector.shape_cast %64 : vector<1x1x8x8xf32> to vector<8x8xf32>
    %66 = vector.shape_cast %63 : vector<8x8xf32> to vector<1x1x8x8xf32>
    tpu.vector_store %arg5[%c0_44, %c0_45, %c0_46, %c56], %66 {strides = array<i32>} : memref<1x1x8x64xf32, #tpu.memory_space<vmem>>, vector<1x1x8x8xf32>,
    return
  }
  func.func @transform_0(%arg0: i32, %arg1: i32) -> (i32, i32) {
    %c0_i32 = arith.constant 0 : i32
    %c0_i32_0 = arith.constant 0 : i32
    %c0_i32_1 = arith.constant 0 : i32
    return %c0_i32, %c0_i32_0 : i32, i32
  }
  func.func @transform_1(%arg0: i32, %arg1: i32) -> (i32, i32, i32) {
    %c0_i32 = arith.constant 0 : i32
    %c0_i32_0 = arith.constant 0 : i32
    %c0_i32_1 = arith.constant 0 : i32
    %c0_i32_2 = arith.constant 0 : i32
    return %c0_i32, %c0_i32_0, %c0_i32_1 : i32, i32, i32
  }
  func.func @transform_2(%arg0: i32, %arg1: i32) -> (i32, i32, i32, i32) {
    %c0_i32 = arith.constant 0 : i32
    %c0_i32_0 = arith.constant 0 : i32
    %c0_i32_1 = arith.constant 0 : i32
    %c0_i32_2 = arith.constant 0 : i32
    return %arg0, %c0_i32, %c0_i32_0, %c0_i32_1 : i32, i32, i32, i32
  }
  func.func @transform_3(%arg0: i32, %arg1: i32) -> (i32, i32, i32, i32) {
    %c0_i32 = arith.constant 0 : i32
    %c0_i32_0 = arith.constant 0 : i32
    %c0_i32_1 = arith.constant 0 : i32
    return %arg0, %arg1, %c0_i32, %c0_i32_0 : i32, i32, i32, i32
  }
}

</mosaic_0001>

<bundles_post_ra>
// kernel: tpu_custom_call.1
= control target key start
LH: loop header
LB: loop body
LE: loop exit
PB: predicated region body
PF: predicated region fallthrough
CT: control target
= control target key end

     0   :  { %8 = vsyncpa [#allocation3], 0  ;;  %s2007_s0 = inlined_call_operand.vmem [shape: f32[32,16], index: 0, kind: input, shape index: {}]   ;;  %s2008_s1 = inlined_call_operand.vmem [shape: f32[4,8,16], index: 1, kind: input, shape index: {}]   ;;  %s2009_s2 = inlined_call_operand.hbm [shape: f32[2,4,16,16], index: 2, kind: input, shape index: {}]   ;;  %s2010_s3 = inlined_call_operand.hbm [shape: f32[2,2,8,64], index: 3, kind: output, shape index: {}]  }
   0x1   :  { %10 = vsyncpa [#allocation3 + $0x1], 0 }
   0x2   :  { %11 = vsyncpa [#allocation4], 0 }
   0x3   :  { %13 = vsyncpa [#allocation4 + $0x1], 0  ;;  %s1713_s12 = smov 0   ;;  %s1715_s13 = smov 0  }
   0x4   :  { %s1717_s14 = smov 0   ;;  %s1719_s15 = smov 0  }
   0x5   :  { %s1721_s16 = smov 0   ;;  %s1723_s17 = smov 0  }
   0x6   :  { %s1725_s18 = smov 0   ;;  %s1727_s19 = smov 0  }
   0x7   :  { %s1729_s20 = smov 0   ;;  %s1731_s21 = smov 0  }
   0x8   :  { %s1733_s22 = smov 0  }
   0x9 LB: > { %2014 = sst [smem:[#allocation8_spill]] %s1674_s21  ;;  %s1267_s23 = sadd.s32 4294967295, %s1678_s22   ;;  %s1678_s22 = sphi %s1733_s22, %s19_s22   ;;  %s1674_s21 = sphi %s1731_s21, %s2024_s21   ;;  %s1670_s20 = sphi %s1729_s20, %s2032_s20   ;;  %s1666_s19 = sphi %s1727_s19, %s2022_s19   ;;  %s1662_s18 = sphi %s1725_s18, %s2031_s18   ;;  %s1658_s17 = sphi %s1723_s17, %s2030_s17   ;;  %s1654_s16 = sphi %s1721_s16, %s2029_s16   ;;  %s1650_s15 = sphi %s1719_s15, %s2028_s15   ;;  %s1646_s14 = sphi %s1717_s14, %s2027_s14   ;;  %s1642_s13 = sphi %s1715_s13, %s2026_s13   ;;  %s1638_s12 = sphi %s1713_s12, %s2025_s12  }
   0xa   : > { %s1268_s24 = sadd.s32 4294967294, %s1678_s22   ;;  %s28_s25 = sadd.s32 1, %s1670_s20 }
   0xb   : > { %s31_s26 = sadd.s32 1, %s1674_s21  ;;  %p29_p0 = scmp.ge.s32.totalorder %s28_s25, 2 }
   0xc   : > { %s80_s27 = sadd.s32 1, %s1658_s17  ;;  %p87_p1 = scmp.ne.s32.totalorder %s1658_s17, %s1654_s16 }
   0xd   : > { %p88_p2 = scmp.eq.s32.totalorder %s1678_s22, 0  ;;  %s2034_s25 = smov (%p29_p0, %s28_s25), 0 }
   0xe   : > { %2015 = sst [smem:[#allocation9_spill]] %s2034_s25  ;;  %s2036_s26 = smov (!%p29_p0, %s31_s26), %s1674_s21 }
   0xf   : > { %p1777_p3 = por %p88_p2, %p87_p1  ;;  %p93_p4 = scmp.ne.s32.totalorder %s1654_s16, %s1650_s15 }
  0x10   : > { %p33_p5 = scmp.ge.s32.totalorder %s2036_s26, 2  ;;  %p94_p6 = scmp.eq.s32.totalorder %s1267_s23, 0 }
  0x11   : > { %s104_s29 = ssub.s32 %s1670_s20, %s2034_s25  ;;  %s108_s30 = sadd.s32 1, %s1646_s14 }
  0x12   : > { %s2038_s26 = smov (%p33_p5, %s2036_s26), 0  ;;  %p1787_p7 = por %p94_p6, %p93_p4 }
  0x13   : > { %2017 = sst [smem:[#allocation10_spill]] %s2038_s26  ;;  %p118_p8 = scmp.ne.s32.totalorder %s1646_s14, %s1642_s13 }
  0x14   : > { %s77_s5 = ssub.s32 %s1674_s21, %s2038_s26  ;;  %p119_p9 = scmp.eq.s32.totalorder %s1267_s23, 3 }
  0x15   : > { %p78_p10 = scmp.eq.s32.totalorder %s77_s5, 0  ;;  %s105_s6 = sor.u32 %s104_s29, %s77_s5 }
  0x16   : > { %p106_p11 = scmp.eq.s32.totalorder %s105_s6, 0  ;;  %p1795_p12 = por %p119_p9, %p118_p8 }
  0x17   : > { %s1800_s8 = scalar_select %p78_p10, %s1658_s17, %s80_s27  }
  0x18   : > { %s1803_s9 = scalar_select %p106_p11, %s1646_s14, %s108_s30  }
  0x19   : > { %p124_p13 = scmp.ne.s32.totalorder %s1642_s13, %s1638_s12  ;;  %p125_p0 = scmp.eq.s32.totalorder %s1268_s24, 3 }
  0x1a   : > { %p1429_p1 = scmp.lt.s32.totalorder %s1678_s22, 4  ;;  %s151_s11 = sand.u32 1, %s1658_s17  }
  0x1b   : > { %p1808_p2 = por %p125_p0, %p124_p13  ;;  %s1271_s15 = sshll.u32 %s151_s11, 6 }
  0x1c   : > { %s1315_s23 = sshll.u32 %s1674_s21, 10  ;;  %s155_s26 = scalar_lea.vmem [#allocation2], %s1271_s15 }
  0x1d   : > { %s161_s6 = scalar_lea.hbm %s2009_s2, %s1315_s23  ;;  %s162_s25 = sshll.u32 %s155_s26, 4  ;;  %s163_s25 = int_to_ptr.vmem [resolvable:$true] %s162_s25 }
  0x1e   : > { %p1819_p4 = pnand %p1429_p1, %p1777_p3  ;;  %p1274_p5 = scmp.ge.s32.totalorder %s1678_s22, 1 }
  0x1f   : > { %s152_s24 = scalar_lea.sflag [#allocation3], %s151_s11  ;;  %s1543_s30 = scalar_lea.vmem %s163_s25, 1024 }
  0x20   : > { %p1532_p6 = pneg %p1819_p4  ;;  %p1544_p8 = scmp.ne.s32.totalorder %s163_s25, %s1543_s30 }
  0x21   : > { %s1680_s21 = smov [#allocation2]  }
  0x22   : > { %p1546_p9 = pnand %p1544_p8, %p1532_p6  ;;  %s1548_s29 = sshll.u32 %s1680_s21, 4  ;;  %s1549_s29 = int_to_ptr.vmem [resolvable:$false] %s1548_s29 }
  0x23   : > { %s1550_s15 = scalar_lea.vmem %s1549_s29, 2048  ;;  %p1551_p11 = scmp.lt.s32.totalorder %s163_s25, %s1549_s29 }
  0x24   : > { %p1547_p10 = pneg %p1546_p9  ;;  %p1552_p13 = scmp.lt.s32.totalorder %s1550_s15, %s1543_s30 }
  0x26   : > { %p1553_p0 = por %p1552_p13, %p1551_p11 }
  0x28   : > { %p1554_p3 = pnand %p1553_p0, %p1547_p10 }
  0x2a   : > { %1557 = shalt.err (!%p1554_p3)
}
  0x2b   : > { %s1681_s26 = smov 128   ;;  %s1682_s28 = smov 8  }
  0x2c   : > { %1424 = dma.hbm_to_vmem [thread:$0]  (!%p1819_p4), %s161_s6, 1024, %s163_s25, %s152_s24, %s1681_s26, %s1681_s26, %s1682_s28  }
  0x2d   : > { %p170_p1 = scmp.lt.s32.totalorder %s1678_s22, 5 }
  0x2f   : > { %p171_p6 = pnand %p1274_p5, %p170_p1 }
  0x30   : > { %s176_s21 = sand.u32 (!%p171_p6), 1, %s1654_s16  }
  0x31   : > { %174 = sbr.rel (%p171_p6) target bundleno = 1174 (0x496), region = 32  ;;  %s1275_s11 = sshll.u32 (!%p171_p6), %s176_s21, 6 }
  0x32   : > { %s177_s23 = scalar_lea.sflag (!%p171_p6), [#allocation3], %s176_s21  ;;  %s1832_s5 = scalar_lea.vmem (!%p171_p6), [#allocation2], %s1275_s11 }
  0x36   : > { %1629 = dma.done.wait (%p1787_p7), %s177_s23, 1024  }
  0x37   : > { %1631 = vsyncadd (%p1787_p7), %s177_s23, 4294966272  ;;  %s1277_s25 = sshll.u32 %s1662_s18, 4  ;;  %v1683_v0 = vmov 0.0   ;;  %vm214_vm0 = vcmask 130048   ;;  %v213_v1 = vld [vmem:[%s1832_s5 + $0x8] sm:$0xff]  ;;  %v212_v2 = vld [vmem:[%s1832_s5] sm:$0xff] }
  0x38   : > { %1356 = vmatprep.subr.mxu1 %v1683_v0  ;;  %s204_s24 = scalar_lea.vmem %s2007_s0, %s1277_s25  ;;  %s209_s4 = scalar_lea.vmem %s2008_s1, %s1277_s25  ;;  %1349 = vmatprep.subr.mxu0 %v213_v1  ;;  %vm1684_vm1 = vmmov 0   ;;  %v1287_v7 = vld [vmem:[%s1832_s5 + $0x18] sm:$0xff]  ;;  %v1286_v10 = vld [vmem:[%s1832_s5 + $0x10] sm:$0xff]  ;;  %v1295_v11 = vld [vmem:[%s1832_s5 + $0x28] sm:$0xff]  ;;  %vm448_vm2 = vcmask 64512   ;;  %vm454_vm3 = vcmask 326912  }
  0x39   : > { %v1845_v3 = vld [vmem:[%s204_s24] sm:$0xff]  ;;  %1350 = vmatpush3.msra.mxu0 %v213_v1  ;;  %v1854_v5 = vld [vmem:[%s204_s24 + $0x8] sm:$0xff]  ;;  %1358 = vmatprep.mubr.msk.f32.mxu1 %vm1684_vm1, %v1683_v0  ;;  %s200_s15 = sand.u32 1, %s1642_s13   ;;  %s1685_s28 = smov 32   ;;  %v1303_v19 = vld [vmem:[%s1832_s5 + $0x38] sm:$0xff]  ;;  %vm684_vm4 = vcmask 130112  }
  0x3a   : > { %1353 = vmatprep.mubr.msk.f32.mxu0 %vm214_vm0, %v1845_v3  ;;  %v1852_v4 = vld [vmem:[%s209_s4] sm:$0xff]  ;;  %1351 = vmatprep.subr.mxu0 %v212_v2  ;;  %v1858_v6 = vld [vmem:[%s209_s4 + $0x8] sm:$0xff]  ;;  %s1276_s26 = sshll.u32 %s200_s15, 3  ;;  %s1686_s11 = smov 40   ;;  %v1302_v27 = vld [vmem:[%s1832_s5 + $0x30] sm:$0xff]  ;;  %vm690_vm5 = vcmask 392512  }
  0x3b   : > { %1357 = vmatpush3.xpose.msk.msra.mxu1 %vm214_vm0, %v1852_v4  ;;  %1352 = vmatpush3.msra.mxu0 %v212_v2  ;;  %s1892_s21 = scalar_lea.vmem [#allocation5], %s1276_s26  ;;  %v1294_v18 = vld [vmem:[%s1832_s5 + $0x20] sm:$0xff]  ;;  %s1687_s23 = smov 8   ;;  %vm920_vm6 = vcmask 195712   ;;  %vm926_vm7 = vcmask 458112   ;;  %vm1156_vm8 = vcmask 261312  }
  0x3c   : > { %1354 = vmatmul.mubr.msk.f32.vlgmr.msra.gmra.mxu0 %vm214_vm0, %v1854_v5  ;;  %1361 = vmatprep.subr.mxu0 %v1683_v0  ;;  %s1688_s5 = smov 48   ;;  %s1689_s25 = smov 16   ;;  %vm1162_vm9 = vcmask 523712  }
  0x3d   : > { %1362 = vmatpush3.xpose.msk.msra.mxu0 %vm214_vm0, %v1858_v6  ;;  %1363 = vmatprep.mubr.msk.f32.mxu0 %vm1684_vm1, %v1683_v0  ;;  %s1690_s6 = smov 56   ;;  %s1691_s27 = smov 24  }
  0x3e   : > { %1373 = vmatprep.subr.mxu0 %v1683_v0  ;;  %1366 = vmatprep.subr.mxu1 %v1287_v7  ;;  %s1311_s24 = sshll.u32 %s1666_s19, 1  ;;  %s1180_s4 = sshll.u32 %s1892_s21, 4  ;;  %s1944_s4 = int_to_ptr.vmem [resolvable:$true] %s1180_s4 }
  0x3f   : > { %s1176_s30 = sadd.s32 %s1662_s18, %s1311_s24  ;;  %s1165_s18 = scalar_lea.sflag [#allocation4], %s200_s15 }
  0x40   : > { %s1312_s29 = sshll.u32 %s1176_s30, 7  ;;  %s1558_s19 = scalar_lea.vmem %s1944_s4, 128 }
  0x41   : > { %p1559_p7 = scmp.ne.s32.totalorder %s1944_s4, %s1558_s19 }
  0x43   : > { %p1560_p4 = pnand %p1559_p7, %p1795_p12 }
  0x45   : > { %p1561_p5 = pneg %p1560_p4 }
  0xfc   : > { %v1355_v8 = vpop.f32.mrf.mxu0 }
  0xfd   : > { %1364 = vmatmul.mubr.msk.f32.vlgmr.msra.gmra.mxu0 %vm214_vm0, %v1355_v8 }
  0xfe   : > { %v287_v9 = vpop.f32.mrf.mxu0  ;;  %1374 = vmatpush3.xpose.msk.msra.mxu0 %vm214_vm0, %v1852_v4  ;;  %1375 = vmatprep.mubr.msk.f32.mxu0 %vm1684_vm1, %v1683_v0 }
  0xff   : > { %1359 = vmatmul.mubr.msk.f32.vlgmr.msra.gmra.mxu1 %vm214_vm0, %v287_v9  ;;  %1383 = vmatprep.subr.mxu0 %v1295_v11 }
 0x100   : > { %1367 = vmatpush3.msra.mxu1 %v1287_v7  ;;  %1370 = vmatprep.mubr.msk.f32.mxu1 %vm214_vm0, %v1845_v3 }
 0x101   : > { %1368 = vmatprep.subr.mxu1 %v1286_v10 }
 0x102   : > { %1369 = vmatpush3.msra.mxu1 %v1286_v10 }
 0x103   : > { %1371 = vmatmul.mubr.msk.f32.vlgmr.msra.gmra.mxu1 %vm214_vm0, %v1854_v5  ;;  %1378 = vmatprep.subr.mxu1 %v1683_v0 }
 0x104   : > { %1379 = vmatpush3.xpose.msk.msra.mxu1 %vm214_vm0, %v1858_v6  ;;  %1380 = vmatprep.mubr.msk.f32.mxu1 %vm1684_vm1, %v1683_v0 }
 0x105   : > { %1390 = vmatprep.subr.mxu1 %v1683_v0 }
 0x1bd   : > { %v444_v12 = vpop.f32.mrf.mxu0 }
 0x1be   : > { %451 = vrot.lane.b32.xlu0 %v444_v12, %s1685_s28 }
 0x1bf   : > { %v368_v13 = vpop.f32.mrf.mxu1  ;;  %v1365_v14 = vpop.f32.mrf.mxu0 }
 0x1c0   : > { %449 = vst.msk [vmem:[%s1892_s21] sm:$0xff] %vm448_vm2, %v368_v13 }
 0x1c1   : > { %v1360_v15 = vpop.f32.mrf.mxu1 }
 0x1c3   : > { %v1372_v16 = vpop.f32.mrf.mxu1 }
 0x1c4   : > { %1381 = vmatmul.mubr.msk.f32.vlgmr.msra.gmra.mxu1 %vm214_vm0, %v1372_v16 }
 0x1c5   : > { %v525_v17 = vpop.f32.mrf.mxu1  ;;  %1391 = vmatpush3.xpose.msk.msra.mxu1 %vm214_vm0, %v1852_v4  ;;  %1392 = vmatprep.mubr.msk.f32.mxu1 %vm1684_vm1, %v1683_v0 }
 0x1c6   : > { %1376 = vmatmul.mubr.msk.f32.vlgmr.msra.gmra.mxu0 %vm214_vm0, %v525_v17  ;;  %1400 = vmatprep.subr.mxu1 %v1303_v19 }
 0x1c7   : > { %1384 = vmatpush3.msra.mxu0 %v1295_v11  ;;  %1387 = vmatprep.mubr.msk.f32.mxu0 %vm214_vm0, %v1845_v3 }
 0x1c8   : > { %1385 = vmatprep.subr.mxu0 %v1294_v18 }
 0x1c9   : > { %1386 = vmatpush3.msra.mxu0 %v1294_v18 }
 0x1ca   : > { %1388 = vmatmul.mubr.msk.f32.vlgmr.msra.gmra.mxu0 %vm214_vm0, %v1854_v5  ;;  %1395 = vmatprep.subr.mxu0 %v1683_v0 }
 0x1cb   : > { %1396 = vmatpush3.xpose.msk.msra.mxu0 %vm214_vm0, %v1858_v6  ;;  %1397 = vmatprep.mubr.msk.f32.mxu0 %vm1684_vm1, %v1683_v0 }
 0x1cc   : > { %1407 = vmatprep.subr.mxu0 %v1683_v0 }
 0x230   : > { %v452_v20 = vpop.permute.xlu0 %451 }
 0x231   : > { %455 = vst.msk [vmem:[%s1892_s21] sm:$0xff] %vm454_vm3, %v452_v20 }
 0x284   : > { %v676_v21 = vpop.f32.mrf.mxu1 }
 0x285   : > { %687 = vrot.lane.b32.xlu1 %v676_v21, %s1686_s11  ;;  %s1942_s11 = scalar_lea.hbm %s2010_s3, %s1312_s29 }
 0x286   : > { %v603_v22 = vpop.f32.mrf.mxu0  ;;  %v1382_v23 = vpop.f32.mrf.mxu1 }
 0x287   : > { %681 = vrot.lane.b32.xlu0 %v603_v22, %s1687_s23  ;;  %s1692_s23 = smov [#allocation5]  }
 0x288   : > { %v1377_v24 = vpop.f32.mrf.mxu0 }
 0x28a   : > { %v1389_v25 = vpop.f32.mrf.mxu0 }
 0x28b   : > { %1398 = vmatmul.mubr.msk.f32.vlgmr.msra.gmra.mxu0 %vm214_vm0, %v1389_v25 }
 0x28c   : > { %v761_v26 = vpop.f32.mrf.mxu0  ;;  %1408 = vmatpush3.xpose.msk.msra.mxu0 %vm214_vm0, %v1852_v4  ;;  %1409 = vmatprep.mubr.msk.f32.mxu0 %vm1684_vm1, %v1683_v0 }
 0x28d   : > { %1393 = vmatmul.mubr.msk.f32.vlgmr.msra.gmra.mxu1 %vm214_vm0, %v761_v26 }
 0x28e   : > { %1401 = vmatpush3.msra.mxu1 %v1303_v19  ;;  %1404 = vmatprep.mubr.msk.f32.mxu1 %vm214_vm0, %v1845_v3 }
 0x28f   : > { %1402 = vmatprep.subr.mxu1 %v1302_v27 }
 0x290   : > { %1403 = vmatpush3.msra.mxu1 %v1302_v27 }
 0x291   : > { %1405 = vmatmul.mubr.msk.f32.vlgmr.msra.gmra.mxu1 %vm214_vm0, %v1854_v5  ;;  %1412 = vmatprep.subr.mxu1 %v1683_v0 }
 0x292   : > { %1413 = vmatpush3.xpose.msk.msra.mxu1 %vm214_vm0, %v1858_v6  ;;  %1414 = vmatprep.mubr.msk.f32.mxu1 %vm1684_vm1, %v1683_v0 }
 0x2f7   : > { %v688_v29 = vpop.permute.xlu1 %687 }
 0x2f9   : > { %v682_v28 = vpop.permute.xlu0 %681 }
 0x2fa   : > { %685 = vst.msk [vmem:[%s1892_s21] sm:$0xff] %vm684_vm4, %v682_v28 }
 0x2fb   : > { %691 = vst.msk [vmem:[%s1892_s21] sm:$0xff] %vm690_vm5, %v688_v29 }
 0x34b   : > { %v912_v30 = vpop.f32.mrf.mxu0 }
 0x34c   : > { %923 = vrot.lane.b32.xlu0 %v912_v30, %s1688_s5  ;;  %s1562_s5 = sshll.u32 %s1692_s23, 4  ;;  %s1563_s5 = int_to_ptr.vmem [resolvable:$false] %s1562_s5 }
 0x34d   : > { %v839_v31 = vpop.f32.mrf.mxu1  ;;  %v1399_v32 = vpop.f32.mrf.mxu0  ;;  %p1565_p8 = scmp.lt.s32.totalorder %s1944_s4, %s1563_s5 }
 0x34e   : > { %917 = vrot.lane.b32.xlu1 %v839_v31, %s1689_s25  ;;  %s1564_s25 = scalar_lea.vmem %s1563_s5, 256 }
 0x34f   : > { %v1394_v33 = vpop.f32.mrf.mxu1  ;;  %p1566_p9 = scmp.lt.s32.totalorder %s1564_s25, %s1558_s19 }
 0x351   : > { %v1406_v34 = vpop.f32.mrf.mxu1  ;;  %p1567_p10 = por %p1566_p9, %p1565_p8 }
 0x352   : > { %1415 = vmatmul.mubr.msk.f32.vlgmr.msra.gmra.mxu1 %vm214_vm0, %v1406_v34 }
 0x353   : > { %v997_v35 = vpop.f32.mrf.mxu1  ;;  %p1568_p11 = pnand %p1567_p10, %p1561_p5 }
 0x354   : > { %1410 = vmatmul.mubr.msk.f32.vlgmr.msra.gmra.mxu0 %vm214_vm0, %v997_v35 }
 0x3be   : > { %v924_v37 = vpop.permute.xlu0 %923 }
 0x3c0   : > { %v918_v36 = vpop.permute.xlu1 %917 }
 0x3c1   : > { %921 = vst.msk [vmem:[%s1892_s21] sm:$0xff] %vm920_vm6, %v918_v36 }
 0x3c2   : > { %927 = vst.msk [vmem:[%s1892_s21] sm:$0xff] %vm926_vm7, %v924_v37 }
 0x412   : > { %v1148_v38 = vpop.f32.mrf.mxu1 }
 0x413   : > { %1159 = vrot.lane.b32.xlu0 %v1148_v38, %s1690_s6 }
 0x414   : > { %v1075_v39 = vpop.f32.mrf.mxu0  ;;  %v1416_v40 = vpop.f32.mrf.mxu1 }
 0x415   : > { %1153 = vrot.lane.b32.xlu1 %v1075_v39, %s1691_s27 }
 0x416   : > { %v1411_v41 = vpop.f32.mrf.mxu0 }
 0x485   : > { %v1160_v43 = vpop.permute.xlu0 %1159 }
 0x487   : > { %v1154_v42 = vpop.permute.xlu1 %1153 }
 0x488   : > { %1157 = vst.msk [vmem:[%s1892_s21] sm:$0xff] %vm1156_vm8, %v1154_v42 }
 0x489   : > { %1163 = vst.msk [vmem:[%s1892_s21] sm:$0xff] %vm1162_vm9, %v1160_v43 }
 0x48a   : > { %1571 = shalt.err (!%p1568_p11)
}
 0x48b   : > { %s1572_s21 = scalar_lea.hbm %s1942_s11, 128  ;;  %s1576_s27 = scalar_lea.hbm %s2010_s3, 512 }
 0x48c   : > { %p1573_p13 = scmp.ne.s32.totalorder %s1942_s11, %s1572_s21  ;;  %p1577_p1 = scmp.lt.s32.totalorder %s1942_s11, %s2010_s3 }
 0x48d   : > { %p1578_p6 = scmp.lt.s32.totalorder %s1576_s27, %s1572_s21 }
 0x48e   : > { %p1574_p0 = pnand %p1573_p13, %p1795_p12 }
 0x48f   : > { %p1579_p7 = por %p1578_p6, %p1577_p1 }
 0x490   : > { %p1575_p3 = pneg %p1574_p0 }
 0x492   : > { %p1580_p4 = pnand %p1579_p7, %p1575_p3 }
 0x494   : > { %1583 = shalt.err (!%p1580_p4)
}
 0x495   : > { %1419 = dma.vmem_to_hbm [thread:$0]  (%p1795_p12), %s1944_s4, 128, %s1942_s11, %s1165_s18  }
 0x496 PF: > { %p1430_p5 = scmp.ge.s32.totalorder %s1678_s22, 2  ;;  %s1192_s29 = sand.u32 1, %s1638_s12  }
 0x497   : > { %s1193_s26 = scalar_lea.sflag [#allocation4], %s1192_s29 }
 0x498   : > { %p1426_p8 = pnand %p1430_p5, %p1808_p2 }
 0x49a   : > { %p1427_p9 = pneg %p1426_p8 }
 0x49c   : > { %1633 = dma.done.wait (%p1427_p9), %s1193_s26, 128  }
 0x49d   : > { %1635 = vsyncadd (%p1427_p9), %s1193_s26, 4294967168  ;;  %s19_s22 = sadd.s32 1, %s1678_s22   ;;  %s2022_s19 = sld [smem:[#allocation8_spill]] }
 0x49e   : > { %p16_p10 = scmp.ge.s32.totalorder %s19_s22, 6   ;;  %s2023_s7 = sld [smem:[#allocation9_spill]] }
 0x49f   : > { %s2024_s21 = sld [smem:[#allocation10_spill]]  ;;  %s2025_s12 = smov %s1642_s13 }
 0x4a0   : > { %s2026_s13 = smov %s1646_s14  ;;  %s2027_s14 = smov %s1803_s9 }
 0x4a1   : > { %s2028_s15 = smov %s1654_s16  ;;  %s2029_s16 = smov %s1658_s17 }
 0x4a2   : > { %s2030_s17 = smov %s1800_s8  ;;  %s2031_s18 = smov %s1670_s20 }
 0x4a3   :  { %18 = sbr.rel (!%p16_p10) target bundleno = 9 (0x9), region = 82 }
 0x4a4   : > { %s2032_s20 = smov %s2023_s7 }
 0x4a8   :  { %1198 = vsyncpa [#allocation3], 1 }
 0x4a9   :  { %1200 = vsyncpa [#allocation3 + $0x1], 1 }
 0x4aa   :  { %1201 = vsyncpa [#allocation4], 1 }
 0x4ab   :  { %1203 = vsyncpa [#allocation4 + $0x1], 1 }

</bundles_post_ra>
